<compile_context>
chip_gen: v6e
topology: v6e:2x2x1
jax: 0.10.0
libtpu: 0.0.40
codegen_flags: <defaults>
</compile_context>

<pallas_src>
from functools import partial

import jax
import jax.numpy as jnp
from jax.experimental import pallas as pl
from jax.experimental.pallas import tpu as pltpu


def graph_nn_kernel(param_ref, x_ref, o_ref, *, layer, cha, feat, eps):
    """param_ref: (layer, C, C, 1); x_ref / o_ref: (TB, C, F)."""
    x = x_ref[...].astype(jnp.float32)                  # (TB, C, F)
    w = param_ref[...].astype(jnp.float32)              # hoisted load + cast
    inv_f = jnp.float32(1.0 / feat)

    # `layer` is small (typically 1-4); a static unroll keeps LLO visibility.
    # TODO(synk): switch to lax.fori_loop with dynamic w[i] indexing if layer >~ 8.
    for i in range(layer):
        # y[b, k, f] = sum_j x[b, j, f] * w[i, j, k]
        # VPU broadcast-FMA: (TB, 1, F) * (C, 1) -> (TB, C, F), summed over j.
        acc = x[:, 0:1, :] * w[i, 0]
        for j in range(1, cha):
            acc = acc + x[:, j:j + 1, :] * w[i, j]

        # InstanceNorm1d over F: biased variance, one-pass statistics.
        s1 = jnp.sum(acc, axis=-1, keepdims=True)        # (TB, C, 1)
        s2 = jnp.sum(acc * acc, axis=-1, keepdims=True)  # (TB, C, 1)
        mean = s1 * inv_f
        var = s2 * inv_f - mean * mean
        y = (acc - mean) * jax.lax.rsqrt(var + eps)

        # ReLU
        x = jnp.maximum(y, 0.0)

    o_ref[...] = x.astype(o_ref.dtype)


def graph_nn_forward(x, param, *, eps=1e-5, target_block_bytes=1 << 20):
    """x: (B, C, H, W) or (B, C, F); param: (layer, C, C, 1) or (layer, C, C).

    Returns (B, C, 1, F), matching the PyTorch module output.
    """
    if x.ndim == 4:
        B, C, H, W = x.shape
        F = H * W
    elif x.ndim == 3:
        B, C, F = x.shape
    else:
        raise ValueError(f"unsupported rank {x.ndim}")
    x2 = x.reshape(B, C, F)

    layer = param.shape[0]
    p = param.reshape(layer, C, C, 1)

    itemsize = jnp.dtype(x2.dtype).itemsize
    per_b = C * F * itemsize
    # ~1 MiB of streamed payload per grid step (tiny per-step tiles were the main
    # bottleneck). F stays whole in a block because the norm reduces over it.
    tb = int(max(1, min(B, target_block_bytes // max(per_b, 1))))
    # Split into >=2 grid steps so "parallel" can use both TensorCores (v7x
    # megacore), but only if each step still moves >= 512 KiB.
    if tb >= B and B >= 2 and ((B + 1) // 2) * per_b >= (512 * 1024):
        tb = int(pl.cdiv(B, 2))
    grid = (pl.cdiv(B, tb),)

    cost = pl.CostEstimate(
        flops=int(layer * (2 * B * C * C * F + 6 * B * C * F)),
        transcendentals=int(layer * B * C),
        bytes_accessed=int(2 * B * C * F * itemsize
                           + p.size * jnp.dtype(p.dtype).itemsize),
    )

    out = pl.pallas_call(
        partial(graph_nn_kernel, layer=layer, cha=C, feat=F, eps=eps),
        out_shape=jax.ShapeDtypeStruct((B, C, F), x2.dtype),
        grid=grid,
        in_specs=[
            pl.BlockSpec((layer, C, C, 1), lambda b: (0, 0, 0, 0)),  # weights resident
            pl.BlockSpec((tb, C, F), lambda b: (b, 0, 0)),           # TB batches / step
        ],
        out_specs=pl.BlockSpec((tb, C, F), lambda b: (b, 0, 0)),
        compiler_params=pltpu.CompilerParams(
            dimension_semantics=("parallel",),
            vmem_limit_bytes=32 * 1024 * 1024,
        ),
        cost_estimate=cost,
    )(p, x2)
    return out.reshape(B, C, 1, F)


def graph_nn_reference(x, param, *, eps=1e-5):
    """Pure-JAX mirror of the PyTorch forward for validation."""
    B, C = x.shape[0], x.shape[1]
    layer = param.shape[0]
    p = param.reshape(layer, C, C, 1)
    xx = x.reshape(B, C, 1, -1)
    for i in range(layer):
        t = xx * p[i:i + 1]                          # (B,C,1,F)*(1,C,C,1)->(B,C,C,F)
        t = jnp.sum(t, axis=1)                       # (B,C,F)
        mean = jnp.mean(t, axis=-1, keepdims=True)
        var = jnp.mean(jnp.square(t - mean), axis=-1, keepdims=True)
        t = (t - mean) / jnp.sqrt(var + eps)
        t = jnp.maximum(t, 0.0)
        xx = t.reshape(B, C, 1, -1)
    return xx


if __name__ == "__main__":
    key = jax.random.PRNGKey(0)
    k_x, k_p, k_x2, k_p2 = jax.random.split(key, 4)

    # Case 1: NCHW input, single layer (module defaults).
    B, C, H, W = 2, 4, 16, 16
    layer = 1
    x = jax.random.normal(k_x, (B, C, H, W), dtype=jnp.float32)
    param = jax.random.normal(k_p, (layer, C, C, 1), dtype=jnp.float32)

    out = jax.block_until_ready(graph_nn_forward(x, param))
    ref = graph_nn_reference(x, param)
    assert out.shape == (B, C, 1, H * W)
    assert jnp.allclose(out, ref, atol=1e-4, rtol=1e-4)

    # Case 2: (B, C, F) input, two layers, several batch elements per block.
    B2, C2, F2, layer2 = 8, 4, 256, 2
    x_b = jax.random.normal(k_x2, (B2, C2, F2), dtype=jnp.float32)
    param_b = jax.random.normal(k_p2, (layer2, C2, C2, 1), dtype=jnp.float32)

    out2 = jax.block_until_ready(graph_nn_forward(x_b, param_b))
    ref2 = graph_nn_reference(x_b, param_b)
    assert out2.shape == (B2, C2, 1, F2)
    assert jnp.allclose(out2, ref2, atol=1e-4, rtol=1e-4)

    print("KERNEL_OK")
</pallas_src>

<mosaic_0001>
module attributes {stable_mosaic.version = 11 : i64} {
  func.func @graph_nn_kernel(%arg0: i32, %arg1: memref<1x4x4x1xf32, #tpu.memory_space<vmem>>, %arg2: memref<2x4x256xf32, #tpu.memory_space<vmem>>, %arg3: memref<2x4x256xf32, #tpu.memory_space<vmem>>) attributes {dimension_semantics = [#tpu.dimension_semantics<parallel>], iteration_bounds = array<i64: 1>, scalar_prefetch = 0 : i64, scratch_operands = 0 : i64, tpu.core_type = #tpu.core_type<tc>, window_params = [{pipeline_mode = #tpu.pipeline_mode<synchronous>, transform_indices = @transform_0, window_bounds = array<i64: 1, 4, 4, 1>}, {transform_indices = @transform_1, window_bounds = array<i64: 2, 4, 256>}, {transform_indices = @transform_2, window_bounds = array<i64: 2, 4, 256>}]} {
    %c0 = arith.constant 0 : index
    %c0_0 = arith.constant 0 : index
    %c0_1 = arith.constant 0 : index
    %0 = vector.load %arg2[%c0, %c0_0, %c0_1] : memref<2x4x256xf32, #tpu.memory_space<vmem>>, vector<2x4x256xf32>
    %c0_2 = arith.constant 0 : index
    %c0_3 = arith.constant 0 : index
    %c0_4 = arith.constant 0 : index
    %c0_5 = arith.constant 0 : index
    %1 = vector.load %arg1[%c0_2, %c0_3, %c0_4, %c0_5] : memref<1x4x4x1xf32, #tpu.memory_space<vmem>>, vector<1x4x4x1xf32>
    %2 = vector.extract_strided_slice %0 {offsets = [0, 0, 0], sizes = [2, 1, 256], strides = [1, 1, 1]} : vector<2x4x256xf32> to vector<2x1x256xf32>
    %3 = vector.extract_strided_slice %1 {offsets = [0, 0, 0, 0], sizes = [1, 1, 4, 1], strides = [1, 1, 1, 1]} : vector<1x4x4x1xf32> to vector<1x1x4x1xf32>
    %4 = vector.shape_cast %3 : vector<1x1x4x1xf32> to vector<4x1xf32>
    %5 = vector.shape_cast %4 : vector<4x1xf32> to vector<1x4x1xf32>
    %6 = vector.broadcast %2 : vector<2x1x256xf32> to vector<2x4x256xf32>
    %7 = vector.broadcast %5 : vector<1x4x1xf32> to vector<2x4x256xf32>
    %8 = arith.mulf %6, %7 : vector<2x4x256xf32>
    %9 = vector.extract_strided_slice %0 {offsets = [0, 1, 0], sizes = [2, 1, 256], strides = [1, 1, 1]} : vector<2x4x256xf32> to vector<2x1x256xf32>
    %10 = vector.extract_strided_slice %1 {offsets = [0, 1, 0, 0], sizes = [1, 1, 4, 1], strides = [1, 1, 1, 1]} : vector<1x4x4x1xf32> to vector<1x1x4x1xf32>
    %11 = vector.shape_cast %10 : vector<1x1x4x1xf32> to vector<4x1xf32>
    %12 = vector.shape_cast %11 : vector<4x1xf32> to vector<1x4x1xf32>
    %13 = vector.broadcast %9 : vector<2x1x256xf32> to vector<2x4x256xf32>
    %14 = vector.broadcast %12 : vector<1x4x1xf32> to vector<2x4x256xf32>
    %15 = arith.mulf %13, %14 : vector<2x4x256xf32>
    %16 = arith.addf %8, %15 : vector<2x4x256xf32>
    %17 = vector.extract_strided_slice %0 {offsets = [0, 2, 0], sizes = [2, 1, 256], strides = [1, 1, 1]} : vector<2x4x256xf32> to vector<2x1x256xf32>
    %18 = vector.extract_strided_slice %1 {offsets = [0, 2, 0, 0], sizes = [1, 1, 4, 1], strides = [1, 1, 1, 1]} : vector<1x4x4x1xf32> to vector<1x1x4x1xf32>
    %19 = vector.shape_cast %18 : vector<1x1x4x1xf32> to vector<4x1xf32>
    %20 = vector.shape_cast %19 : vector<4x1xf32> to vector<1x4x1xf32>
    %21 = vector.broadcast %17 : vector<2x1x256xf32> to vector<2x4x256xf32>
    %22 = vector.broadcast %20 : vector<1x4x1xf32> to vector<2x4x256xf32>
    %23 = arith.mulf %21, %22 : vector<2x4x256xf32>
    %24 = arith.addf %16, %23 : vector<2x4x256xf32>
    %25 = vector.extract_strided_slice %0 {offsets = [0, 3, 0], sizes = [2, 1, 256], strides = [1, 1, 1]} : vector<2x4x256xf32> to vector<2x1x256xf32>
    %26 = vector.extract_strided_slice %1 {offsets = [0, 3, 0, 0], sizes = [1, 1, 4, 1], strides = [1, 1, 1, 1]} : vector<1x4x4x1xf32> to vector<1x1x4x1xf32>
    %27 = vector.shape_cast %26 : vector<1x1x4x1xf32> to vector<4x1xf32>
    %28 = vector.shape_cast %27 : vector<4x1xf32> to vector<1x4x1xf32>
    %29 = vector.broadcast %25 : vector<2x1x256xf32> to vector<2x4x256xf32>
    %30 = vector.broadcast %28 : vector<1x4x1xf32> to vector<2x4x256xf32>
    %31 = arith.mulf %29, %30 : vector<2x4x256xf32>
    %32 = arith.addf %24, %31 : vector<2x4x256xf32>
    %cst = arith.constant dense<0.000000e+00> : vector<2x4xf32>
    %33 = vector.multi_reduction <add>, %32, %cst [2] : vector<2x4x256xf32> to vector<2x4xf32>
    %34 = vector.shape_cast %33 : vector<2x4xf32> to vector<2x4x1xf32>
    %35 = arith.mulf %32, %32 : vector<2x4x256xf32>
    %cst_6 = arith.constant dense<0.000000e+00> : vector<2x4xf32>
    %36 = vector.multi_reduction <add>, %35, %cst_6 [2] : vector<2x4x256xf32> to vector<2x4xf32>
    %37 = vector.shape_cast %36 : vector<2x4xf32> to vector<2x4x1xf32>
    %cst_7 = arith.constant 3.906250e-03 : f32
    %38 = vector.broadcast %cst_7 : f32 to vector<2x4x1xf32>
    %39 = arith.mulf %34, %38 : vector<2x4x1xf32>
    %cst_8 = arith.constant 3.906250e-03 : f32
    %40 = vector.broadcast %cst_8 : f32 to vector<2x4x1xf32>
    %41 = arith.mulf %37, %40 : vector<2x4x1xf32>
    %42 = arith.mulf %39, %39 : vector<2x4x1xf32>
    %43 = arith.subf %41, %42 : vector<2x4x1xf32>
    %44 = vector.broadcast %39 : vector<2x4x1xf32> to vector<2x4x256xf32>
    %45 = arith.subf %32, %44 : vector<2x4x256xf32>
    %cst_9 = arith.constant 9.99999974E-6 : f32
    %46 = vector.broadcast %cst_9 : f32 to vector<2x4x1xf32>
    %47 = arith.addf %43, %46 : vector<2x4x1xf32>
    %48 = math.rsqrt %47 : vector<2x4x1xf32>
    %49 = vector.broadcast %48 : vector<2x4x1xf32> to vector<2x4x256xf32>
    %50 = arith.mulf %45, %49 : vector<2x4x256xf32>
    %cst_10 = arith.constant 0.000000e+00 : f32
    %51 = vector.broadcast %cst_10 : f32 to vector<2x4x256xf32>
    %52 = arith.maximumf %50, %51 : vector<2x4x256xf32>
    %c0_11 = arith.constant 0 : index
    %c0_12 = arith.constant 0 : index
    %c0_13 = arith.constant 0 : index
    %53 = vector.load %arg3[%c0_11, %c0_12, %c0_13] : memref<2x4x256xf32, #tpu.memory_space<vmem>>, vector<2x4x256xf32>
    tpu.vector_store %arg3[%c0_11, %c0_12, %c0_13], %52 {strides = array<i32>} : memref<2x4x256xf32, #tpu.memory_space<vmem>>, vector<2x4x256xf32>,
    return
  }
  func.func @transform_0(%arg0: i32) -> (i32, i32, i32, i32) {
    %c0_i32 = arith.constant 0 : i32
    %c0_i32_0 = arith.constant 0 : i32
    %c0_i32_1 = arith.constant 0 : i32
    %c0_i32_2 = arith.constant 0 : i32
    %c0_i32_3 = arith.constant 0 : i32
    return %c0_i32, %c0_i32_0, %c0_i32_1, %c0_i32_2 : i32, i32, i32, i32
  }
  func.func @transform_1(%arg0: i32) -> (i32, i32, i32) {
    %c0_i32 = arith.constant 0 : i32
    %c0_i32_0 = arith.constant 0 : i32
    %c0_i32_1 = arith.constant 0 : i32
    return %arg0, %c0_i32, %c0_i32_0 : i32, i32, i32
  }
  func.func @transform_2(%arg0: i32) -> (i32, i32, i32) {
    %c0_i32 = arith.constant 0 : i32
    %c0_i32_0 = arith.constant 0 : i32
    %c0_i32_1 = arith.constant 0 : i32
    return %arg0, %c0_i32, %c0_i32_0 : i32, i32, i32
  }
}

</mosaic_0001>

<bundles_post_ra>
// kernel: tpu_custom_call.1
= control target key start
LH: loop header
LB: loop body
LE: loop exit
PB: predicated region body
PF: predicated region fallthrough
CT: control target
= control target key end

     0   :  { %v319_v2 = vmov 0   ;;  %s367_s0 = inlined_call_operand.vmem [shape: f32[1,4,4,1], index: 0, kind: input, shape index: {}]   ;;  %s368_s1 = inlined_call_operand.vmem [shape: f32[2,4,256], index: 1, kind: input, shape index: {}]   ;;  %s369_s2 = inlined_call_operand.hbm [shape: f32[2,4,256], index: 2, kind: output, shape index: {}]  }
   0x1   :  { %v16_v0 = vld [vmem:[%s367_s0 + $0x8] sm:$0xf]  ;;  %v14_v1 = vld [vmem:[%s367_s0] sm:$0xf]  ;;  %292 = vset.pattern.permute.xlu1 %v319_v2  ;;  %291 = vset.pattern.permute.xlu0 %v319_v2 }
   0x2   :  { %152 = vperm.xlu1 %292, %v16_v0   ;;  %58 = vperm.xlu0 %291, %v14_v1  }
   0x3   :  { %7 = vsyncpa [#allocation3], 0  ;;  %v17_v3 = vld [vmem:[%s367_s0 + $0xc] sm:$0xf]  ;;  %v15_v4 = vld [vmem:[%s367_s0 + $0x4] sm:$0xf]  ;;  %v20_v5 = vlaneseq }
   0x4   :  { %v12_v9 = vld [vmem:[%s368_s1] sm:$0xff]  ;;  %v13_v10 = vld [vmem:[%s368_s1 + $0x8] sm:$0xff]  ;;  %vm212_vm0 = vcmask 1043456   ;;  %s320_s0 = smov [#allocation2]  }
   0x5   :  { %v21_v6 = vshrl.u32 %v20_v5, 7  ;;  %s276_s1 = sshll.u32 %s320_s0, 4  ;;  %s277_s1 = int_to_ptr.vmem [resolvable:$true] %s276_s1 }
   0x6   :  { %201 = vperm.xlu1 %292, %v17_v3   ;;  %103 = vperm.xlu0 %291, %v15_v4   ;;  %s297_s21 = scalar_lea.vmem %s277_s1, 256  ;;  %p302_p1 = scmp.lt.s32.totalorder %s277_s1, %s277_s1 }
   0x7   :  { %v22_v7 = vsub.s32 0, %v21_v6  ;;  %v26_v8 = vsub.s32 4, %v21_v6  ;;  %v67_v11 = vsub.s32 1, %v21_v6  ;;  %v71_v12 = vsub.s32 5, %v21_v6  ;;  %p298_p0 = scmp.ne.s32.totalorder %s277_s1, %s297_s21  ;;  %p303_p2 = scmp.lt.s32.totalorder %s297_s21, %s297_s21 }
   0x8   :  { %v116_v13 = vsub.s32 2, %v21_v6  ;;  %v120_v14 = vsub.s32 6, %v21_v6  ;;  %v165_v15 = vsub.s32 3, %v21_v6  ;;  %v169_v16 = vsub.s32 7, %v21_v6 }
   0x9   :  { %v23_v17 = vrot.slane %v12_v9, %v22_v7  ;;  %v27_v18 = vrot.slane %v12_v9, %v26_v8  ;;  %v31_v19 = vrot.slane %v13_v10, %v22_v7  ;;  %v35_v20 = vrot.slane %v13_v10, %v26_v8  ;;  %p304_p3 = por %p303_p2, %p302_p1 }
   0xa   :  { %v68_v21 = vrot.slane %v12_v9, %v67_v11  ;;  %v72_v22 = vrot.slane %v12_v9, %v71_v12  ;;  %v76_v23 = vrot.slane %v13_v10, %v67_v11  ;;  %v80_v24 = vrot.slane %v13_v10, %v71_v12 }
   0xb   :  { %v117_v25 = vrot.slane %v12_v9, %v116_v13  ;;  %v121_v26 = vrot.slane %v12_v9, %v120_v14  ;;  %v125_v27 = vrot.slane %v13_v10, %v116_v13  ;;  %v129_v28 = vrot.slane %v13_v10, %v120_v14  ;;  %p305_p4 = pnand %p304_p3, %p298_p0 }
   0xc   :  { %v166_v31 = vrot.slane %v12_v9, %v165_v15  ;;  %v170_v32 = vrot.slane %v12_v9, %v169_v16  ;;  %v174_v33 = vrot.slane %v13_v10, %v165_v15  ;;  %v178_v34 = vrot.slane %v13_v10, %v169_v16 }
   0xd   :  { %v43_v35 = vrot.slane %v23_v17, %v22_v7  ;;  %v47_v36 = vrot.slane %v27_v18, %v22_v7  ;;  %v51_v37 = vrot.slane %v31_v19, %v22_v7  ;;  %v55_v38 = vrot.slane %v35_v20, %v22_v7 }
   0xe   :  { %v88_v39 = vrot.slane %v68_v21, %v67_v11  ;;  %v92_v40 = vrot.slane %v72_v22, %v67_v11  ;;  %v96_v41 = vrot.slane %v76_v23, %v67_v11  ;;  %v100_v42 = vrot.slane %v80_v24, %v67_v11 }
   0xf   :  { %v137_v43 = vrot.slane %v117_v25, %v116_v13  ;;  %v141_v44 = vrot.slane %v121_v26, %v116_v13  ;;  %v145_v45 = vrot.slane %v125_v27, %v116_v13  ;;  %v149_v46 = vrot.slane %v129_v28, %v116_v13 }
  0x10   :  { %v186_v47 = vrot.slane %v166_v31, %v165_v15  ;;  %v190_v48 = vrot.slane %v170_v32, %v165_v15  ;;  %v194_v49 = vrot.slane %v174_v33, %v165_v15  ;;  %v198_v50 = vrot.slane %v178_v34, %v165_v15 }
  0x7d   :  { %v153_v29 = vpop.permute.xlu1 %152  ;;  %v59_v30 = vpop.permute.xlu0 %58 }
  0x7e   :  { %v61_v52 = vmul.f32 %v59_v30, %v43_v35  ;;  %v62_v53 = vmul.f32 %v59_v30, %v47_v36  ;;  %v63_v54 = vmul.f32 %v59_v30, %v51_v37  ;;  %v64_v55 = vmul.f32 %v59_v30, %v55_v38 }
  0x7f   :  { %v155_v61 = vmul.f32 %v153_v29, %v137_v43  ;;  %v156_v62 = vmul.f32 %v153_v29, %v141_v44  ;;  %v157_v63 = vmul.f32 %v153_v29, %v145_v45  ;;  %v158_v0 = vmul.f32 %v153_v29, %v149_v46 }
  0x81   :  { %v104_v51 = vpop.permute.xlu0 %103  ;;  %v202_v56 = vpop.permute.xlu1 %201 }
  0x82   :  { %v106_v57 = vmul.f32 %v104_v51, %v88_v39  ;;  %v107_v58 = vmul.f32 %v104_v51, %v92_v40  ;;  %v108_v59 = vmul.f32 %v104_v51, %v96_v41  ;;  %v109_v60 = vmul.f32 %v104_v51, %v100_v42 }
  0x83   :  { %v204_v5 = vmul.f32 %v202_v56, %v186_v47  ;;  %v205_v6 = vmul.f32 %v202_v56, %v190_v48  ;;  %v206_v7 = vmul.f32 %v202_v56, %v194_v49  ;;  %v207_v8 = vmul.f32 %v202_v56, %v198_v50 }
  0x84   :  { %v110_v1 = vadd.f32 %v106_v57, %v61_v52  ;;  %v111_v2 = vadd.f32 %v107_v58, %v62_v53  ;;  %v112_v3 = vadd.f32 %v108_v59, %v63_v54  ;;  %v113_v4 = vadd.f32 %v109_v60, %v64_v55 }
  0x86   :  { %v161_v9 = vadd.f32 %v157_v63, %v112_v3  ;;  %v162_v10 = vadd.f32 %v158_v0, %v113_v4  ;;  %v159_v11 = vadd.f32 %v155_v61, %v110_v1  ;;  %v160_v12 = vadd.f32 %v156_v62, %v111_v2 }
  0x88   :  { %v210_v13 = vadd.f32 %v206_v7, %v161_v9  ;;  %v211_v14 = vadd.f32 %v207_v8, %v162_v10  ;;  %v208_v15 = vadd.f32 %v204_v5, %v159_v11  ;;  %v209_v16 = vadd.f32 %v205_v6, %v160_v12 }
  0x8a   :  { %v218_v17 = vsel %vm212_vm0, %v210_v13, 0.0  ;;  %v219_v18 = vsel %vm212_vm0, %v211_v14, 0.0  ;;  %v213_v19 = vsel %vm212_vm0, %v208_v15, 0.0  ;;  %v214_v20 = vsel %vm212_vm0, %v209_v16, 0.0 }
  0x8b   :  { %v220_v21 = vadd.f32 %v219_v18, %v218_v17  ;;  %v215_v22 = vadd.f32 %v214_v20, %v213_v19  ;;  %v223_v23 = vmul.f32 %v208_v15, %v208_v15  ;;  %v224_v24 = vmul.f32 %v209_v16, %v209_v16 }
  0x8c   :  { %v225_v25 = vmul.f32 %v210_v13, %v210_v13  ;;  %v226_v26 = vmul.f32 %v211_v14, %v211_v14 }
  0x8d   :  { %221 = vadd.xlane.f32.xlu1 %v220_v21  ;;  %216 = vadd.xlane.f32.xlu0 %v215_v22  ;;  %v227_v27 = vsel %vm212_vm0, %v223_v23, 0.0  ;;  %v228_v28 = vsel %vm212_vm0, %v224_v24, 0.0 }
  0x8e   :  { %v229_v29 = vadd.f32 %v228_v28, %v227_v27  ;;  %v232_v30 = vsel %vm212_vm0, %v225_v25, 0.0  ;;  %v233_v31 = vsel %vm212_vm0, %v226_v26, 0.0 }
  0x8f   :  { %v234_v32 = vadd.f32 %v233_v31, %v232_v30 }
  0x91   :  { %230 = vadd.xlane.f32.xlu0 %v229_v29 }
  0x95   :  { %235 = vadd.xlane.f32.xlu0 %v234_v32 }
 0x116   :  { %v217_v33 = vpop.xlane.xlu0 %216  ;;  %v222_v35 = vpop.xlane.xlu1 %221 }
 0x117   :  { %v237_v34 = vmul.f32 0.00390625, %v217_v33  ;;  %v238_v37 = vmul.f32 0.00390625, %v222_v35 }
 0x119   :  { %v241_v38 = vmul.f32 %v237_v34, %v237_v34  ;;  %v242_v43 = vmul.f32 %v238_v37, %v238_v37  ;;  %v245_v47 = vsub.f32 %v208_v15, %v237_v34  ;;  %v246_v48 = vsub.f32 %v209_v16, %v237_v34 }
 0x11a   :  { %v231_v36 = vpop.xlane.xlu0 %230  ;;  %v247_v52 = vsub.f32 %v210_v13, %v238_v37  ;;  %v248_v53 = vsub.f32 %v211_v14, %v238_v37 }
 0x11b   :  { %v239_v39 = vmul.f32 0.00390625, %v231_v36 }
 0x11d   :  { %v243_v40 = vsub.f32 %v239_v39, %v241_v38 }
 0x11e   :  { %v236_v41 = vpop.xlane.xlu0 %235 }
 0x11f   :  { %v249_v42 = vadd.f32 1e-05, %v243_v40  ;;  %v240_v44 = vmul.f32 0.00390625, %v236_v41 }
 0x121   :  { %293 = vrsqrt.f32 %v249_v42  ;;  %v244_v45 = vsub.f32 %v240_v44, %v242_v43 }
 0x123   :  { %v250_v46 = vadd.f32 1e-05, %v244_v45 }
 0x125   :  { %295 = vrsqrt.f32 %v250_v46 }
 0x12e   :  { %v294_v49 = vpop.eup %293 }
 0x12f   :  { %v253_v50 = vmul.f32 %v294_v49, %v245_v47  ;;  %v254_v51 = vmul.f32 %v294_v49, %v246_v48 }
 0x131   :  { %v257_v54 = vmax.f32 %v253_v50, 0.0  ;;  %v258_v55 = vmax.f32 %v254_v51, 0.0 }
 0x132   :  { %v296_v56 = vpop.eup %295 }
 0x133   :  { %v255_v57 = vmul.f32 %v296_v56, %v247_v52  ;;  %v256_v58 = vmul.f32 %v296_v56, %v248_v53  ;;  %v265_v59 = vcombine.low %v257_v54, %v258_v55 }
 0x135   :  { %v259_v60 = vmax.f32 %v255_v57, 0.0  ;;  %v260_v61 = vmax.f32 %v256_v58, 0.0  ;;  %269 = vst [vmem:[#allocation2] sm:$0xff] %v265_v59 }
 0x137   :  { %v266_v62 = vcombine.low %v259_v60, %v260_v61 }
 0x139   :  { %270 = vst [vmem:[#allocation2 + $0x8] sm:$0xff] %v266_v62 }
 0x13a   :  { %308 = shalt.err (!%p305_p4)
}
 0x13b   :  { %s321_s22 = smov 128   ;;  %s322_s23 = smov 8  }
 0x13c   :  { %282 = dma.vmem_to_hbm [thread:$0]  %s277_s1, 256, %s369_s2, [#allocation3], %s321_s22, %s321_s22, %s322_s23  }
 0x13d   :  { %317 = dma.done.wait [#allocation3], 256  }
 0x13e   :  { %318 = vsyncadd [#allocation3], 4294967040 }
 0x13f   :  { %286 = vsyncpa [#allocation3], 1 }

</bundles_post_ra>
